<compile_context>
chip_gen: v7x
topology: tpu7x:2x2x1
jax: 0.10.0
libtpu: 0.0.40
codegen_flags: <defaults>
</compile_context>

<pallas_src>
import functools
import math

import numpy as np
import jax
import jax.numpy as jnp
from jax.experimental import pallas as pl
from jax.experimental.pallas import tpu as pltpu

GAMMA = 2
LANE = 128
ROW_PACK = 16          # row-padding granularity (bf16 sublane packing friendly)
MAX_TILE_ROWS = 8192   # 8192 x 128 x 4B = 4 MiB/block; 2 inputs x 2 bufs = 16 MiB
VMEM_LIMIT = 32 * 1024 * 1024


def _focal_kernel(x_ref, y_ref, out_ref, *, tile_rows, rows_total,
                  tiles_per_split, gamma):
    c = pl.program_id(0)   # "parallel" split (second TensorCore on v7x)
    i = pl.program_id(1)   # "arbitrary" streaming axis within the split

    # (1, 8, 128) output block is resident across the i axis -> vreg-wide
    # partial-sum accumulator.
    @pl.when(i == 0)
    def _():
        out_ref[...] = jnp.zeros_like(out_ref)

    x = x_ref[...].astype(jnp.float32)
    y = y_ref[...].astype(jnp.float32)

    # Stable BCE-with-logits (reduction='none', weight=None).
    bce = jnp.maximum(x, 0.0) - x * y + jnp.log1p(jnp.exp(-jnp.abs(x)))
    p = jnp.exp(-bce)
    om = 1.0 - p

    # (1 - p)**gamma * bce with integer gamma unrolled into VPU multiplies.
    focal = bce
    for _ in range(gamma):
        focal = focal * om

    # Global block index and number of valid rows in this block.  Full blocks
    # skip masking entirely; only the ragged last block and the (at most one)
    # overhang block from the 2-way split take the masked path.
    b = c * tiles_per_split + i
    valid_rows = rows_total - b * tile_rows

    def _accum(vals):
        # (tile_rows,128) -> (tile_rows//8, 8, 128), reduce across vreg tiles:
        # pure VPU adds, no cross-lane/XLU work.
        out_ref[...] += vals.reshape(tile_rows // 8, 8, LANE).sum(axis=0)[None]

    @pl.when(valid_rows >= tile_rows)
    def _():
        _accum(focal)

    @pl.when(valid_rows < tile_rows)
    def _():
        row_id = jax.lax.broadcasted_iota(jnp.int32, focal.shape, 0)
        _accum(jnp.where(row_id < valid_rows, focal, 0.0))


def focal_loss(logits, target, gamma=GAMMA, *, max_tile_rows=MAX_TILE_ROWS):
    assert logits.shape == target.shape
    assert gamma >= 0
    assert float(gamma).is_integer(), "non-integer gamma not supported"  # TODO(synk)
    assert max_tile_rows % ROW_PACK == 0
    gamma = int(gamma)

    n = int(np.prod(logits.shape))
    assert n > 0

    # Lane/sublane-dense layout: flatten to (rows_pad, 128) with rows_pad a
    # multiple of 16.  Padding is at most 2047 zeros (sub-tile tail only).
    rows_pad = ((n + ROW_PACK * LANE - 1) // (ROW_PACK * LANE)) * ROW_PACK
    pad = rows_pad * LANE - n

    x = logits.reshape(-1)
    y = target.reshape(-1)
    if pad:
        x = jnp.pad(x, (0, pad))
        y = jnp.pad(y, (0, pad))
    x = x.reshape(rows_pad, LANE)
    y = y.reshape(rows_pad, LANE)

    tile_rows = min(max_tile_rows, rows_pad)
    num_tiles = -(-rows_pad // tile_rows)
    nsplit = 2 if num_tiles >= 2 else 1          # 2 TCs on v7x; harmless elsewhere
    tps = -(-num_tiles // nsplit)                # tiles per split (>=1)

    def in_map(c, i):
        # Clamp the (at most one) overhang block of the 2-way split so its DMA
        # stays in bounds; the kernel masks its contribution to zero.
        return (jnp.minimum(c * tps + i, num_tiles - 1), 0)

    kernel = functools.partial(
        _focal_kernel,
        tile_rows=tile_rows,
        rows_total=rows_pad,
        tiles_per_split=tps,
        gamma=gamma,
    )

    partials = pl.pallas_call(
        kernel,
        grid=(nsplit, tps),
        in_specs=[
            pl.BlockSpec((tile_rows, LANE), in_map),
            pl.BlockSpec((tile_rows, LANE), in_map),
        ],
        out_specs=pl.BlockSpec((1, 8, LANE), lambda c, i: (c, 0, 0)),
        out_shape=jax.ShapeDtypeStruct((nsplit, 8, LANE), jnp.float32),
        compiler_params=pltpu.CompilerParams(
            dimension_semantics=("parallel", "arbitrary"),
            vmem_limit_bytes=VMEM_LIMIT,
            allow_input_fusion=[True, True],
        ),
    )(x, y)

    # Each zero-padded element (x=0, y=0) contributes exactly (0.5**gamma)*ln(2).
    pad_c = (0.5 ** gamma) * math.log(2.0)
    total = jnp.sum(partials, dtype=jnp.float32) - jnp.float32(pad * pad_c)
    return total / jnp.float32(n)


def _ref_focal_loss(logits, target, gamma=GAMMA):
    """float64 numpy reference mirroring the PyTorch module."""
    x = np.asarray(logits, np.float64)
    y = np.asarray(target, np.float64)
    bce = np.maximum(x, 0.0) - x * y + np.log1p(np.exp(-np.abs(x)))
    p = np.exp(-bce)
    return float(np.mean((1.0 - p) ** gamma * bce))


if __name__ == "__main__":
    key = jax.random.PRNGKey(0)

    # Test 1: module-sized input [B, C, H, W] = [2, 4, 16, 16], f32.
    k1, k2 = jax.random.split(key)
    shape = (2, 4, 16, 16)
    logits = jax.random.normal(k1, shape, dtype=jnp.float32) * 3.0
    target = jax.random.bernoulli(k2, 0.3, shape).astype(jnp.float32)

    loss = focal_loss(logits, target)
    jax.block_until_ready(loss)
    ref = _ref_focal_loss(np.asarray(logits), np.asarray(target))
    np.testing.assert_allclose(float(loss), ref, rtol=1e-4, atol=1e-6)

    # Test 2: odd shape with small tiles -> exercises sub-tile zero padding,
    # ragged last block, 2-way split and the overhang block.
    k3, k4 = jax.random.split(k2)
    shape2 = (3, 5, 33, 17)
    logits2 = jax.random.normal(k3, shape2, dtype=jnp.float32) * 2.0
    target2 = jax.random.bernoulli(k4, 0.5, shape2).astype(jnp.float32)

    loss2 = focal_loss(logits2, target2, max_tile_rows=32)
    jax.block_until_ready(loss2)
    ref2 = _ref_focal_loss(np.asarray(logits2), np.asarray(target2))
    np.testing.assert_allclose(float(loss2), ref2, rtol=1e-4, atol=1e-6)

    # Test 3: bf16 passthrough (no wrapper-side upcast; kernel upcasts in-register).
    logits_bf16 = logits.astype(jnp.bfloat16)
    target_bf16 = target.astype(jnp.bfloat16)
    loss3 = focal_loss(logits_bf16, target_bf16)
    jax.block_until_ready(loss3)
    ref3 = _ref_focal_loss(np.asarray(logits_bf16.astype(jnp.float32)),
                           np.asarray(target_bf16.astype(jnp.float32)))
    np.testing.assert_allclose(float(loss3), ref3, rtol=1e-3, atol=1e-5)

    print("KERNEL_OK")
</pallas_src>

<mosaic_0001>
module attributes {stable_mosaic.version = 11 : i64} {
  func.func @_focal_kernel(%arg0: i32, %arg1: i32, %arg2: memref<16x128xf32, #tpu.memory_space<vmem>>, %arg3: memref<16x128xf32, #tpu.memory_space<vmem>>, %arg4: memref<1x8x128xf32, #tpu.memory_space<vmem>>) attributes {dimension_semantics = [#tpu.dimension_semantics<parallel>, #tpu.dimension_semantics<arbitrary>], iteration_bounds = array<i64: 1, 1>, scalar_prefetch = 0 : i64, scratch_operands = 0 : i64, tpu.core_type = #tpu.core_type<tc>, window_params = [{transform_indices = @transform_0, window_bounds = array<i64: 16, 128>}, {transform_indices = @transform_1, window_bounds = array<i64: 16, 128>}, {transform_indices = @transform_2, window_bounds = array<i64: 1, 8, 128>}]} {
    %c0_i32 = arith.constant 0 : i32
    %0 = arith.cmpi eq, %arg1, %c0_i32 : i32
    %1 = arith.extui %0 : i1 to i32
    %c0_i32_0 = arith.constant 0 : i32
    %2 = arith.cmpi ne, %1, %c0_i32_0 : i32
    scf.if %2 {
      %cst_12 = arith.constant 0.000000e+00 : f32
      %32 = vector.broadcast %cst_12 : f32 to vector<1x8x128xf32>
      %c0_13 = arith.constant 0 : index
      %c0_14 = arith.constant 0 : index
      %c0_15 = arith.constant 0 : index
      %33 = vector.load %arg4[%c0_13, %c0_14, %c0_15] : memref<1x8x128xf32, #tpu.memory_space<vmem>>, vector<1x8x128xf32>
      tpu.vector_store %arg4[%c0_13, %c0_14, %c0_15], %32 {strides = array<i32>} : memref<1x8x128xf32, #tpu.memory_space<vmem>>, vector<1x8x128xf32>,
    } else {
    }
    %c0 = arith.constant 0 : index
    %c0_1 = arith.constant 0 : index
    %3 = vector.load %arg2[%c0, %c0_1] : memref<16x128xf32, #tpu.memory_space<vmem>>, vector<16x128xf32>
    %c0_2 = arith.constant 0 : index
    %c0_3 = arith.constant 0 : index
    %4 = vector.load %arg3[%c0_2, %c0_3] : memref<16x128xf32, #tpu.memory_space<vmem>>, vector<16x128xf32>
    %cst = arith.constant 0.000000e+00 : f32
    %5 = vector.broadcast %cst : f32 to vector<16x128xf32>
    %6 = arith.maximumf %3, %5 : vector<16x128xf32>
    %7 = arith.mulf %3, %4 : vector<16x128xf32>
    %8 = arith.subf %6, %7 : vector<16x128xf32>
    %9 = math.absf %3 : vector<16x128xf32>
    %cst_4 = arith.constant 0.000000e+00 : f32
    %10 = vector.broadcast %cst_4 : f32 to vector<16x128xf32>
    %11 = arith.subf %10, %9 : vector<16x128xf32>
    %12 = math.exp %11 : vector<16x128xf32>
    %13 = math.log1p %12 : vector<16x128xf32>
    %14 = arith.addf %8, %13 : vector<16x128xf32>
    %cst_5 = arith.constant 0.000000e+00 : f32
    %15 = vector.broadcast %cst_5 : f32 to vector<16x128xf32>
    %16 = arith.subf %15, %14 : vector<16x128xf32>
    %17 = math.exp %16 : vector<16x128xf32>
    %cst_6 = arith.constant 1.000000e+00 : f32
    %18 = vector.broadcast %cst_6 : f32 to vector<16x128xf32>
    %19 = arith.subf %18, %17 : vector<16x128xf32>
    %20 = arith.mulf %14, %19 : vector<16x128xf32>
    %21 = arith.mulf %20, %19 : vector<16x128xf32>
    %c1_i32 = arith.constant 1 : i32
    %22 = arith.muli %arg0, %c1_i32 : i32
    %23 = arith.addi %22, %arg1 : i32
    %c16_i32 = arith.constant 16 : i32
    %24 = arith.muli %23, %c16_i32 : i32
    %c16_i32_7 = arith.constant 16 : i32
    %25 = arith.subi %c16_i32_7, %24 : i32
    %c16_i32_8 = arith.constant 16 : i32
    %26 = arith.cmpi sge, %25, %c16_i32_8 : i32
    %27 = arith.extui %26 : i1 to i32
    %c0_i32_9 = arith.constant 0 : i32
    %28 = arith.cmpi ne, %27, %c0_i32_9 : i32
    scf.if %28 {
      %c0_12 = arith.constant 0 : index
      %c0_13 = arith.constant 0 : index
      %c0_14 = arith.constant 0 : index
      %32 = vector.load %arg4[%c0_12, %c0_13, %c0_14] : memref<1x8x128xf32, #tpu.memory_space<vmem>>, vector<1x8x128xf32>
      %33 = vector.shape_cast %21 : vector<16x128xf32> to vector<2x8x128xf32>
      %cst_15 = arith.constant dense<0.000000e+00> : vector<8x128xf32>
      %34 = vector.multi_reduction <add>, %33, %cst_15 [0] : vector<2x8x128xf32> to vector<8x128xf32>
      %35 = vector.shape_cast %34 : vector<8x128xf32> to vector<1x8x128xf32>
      %36 = arith.addf %32, %35 : vector<1x8x128xf32>
      %c0_16 = arith.constant 0 : index
      %c0_17 = arith.constant 0 : index
      %c0_18 = arith.constant 0 : index
      %37 = vector.load %arg4[%c0_16, %c0_17, %c0_18] : memref<1x8x128xf32, #tpu.memory_space<vmem>>, vector<1x8x128xf32>
      tpu.vector_store %arg4[%c0_16, %c0_17, %c0_18], %36 {strides = array<i32>} : memref<1x8x128xf32, #tpu.memory_space<vmem>>, vector<1x8x128xf32>,
    } else {
    }
    %c16_i32_10 = arith.constant 16 : i32
    %29 = arith.cmpi slt, %25, %c16_i32_10 : i32
    %30 = arith.extui %29 : i1 to i32
    %c0_i32_11 = arith.constant 0 : i32
    %31 = arith.cmpi ne, %30, %c0_i32_11 : i32
    scf.if %31 {
      %32 = tpu.iota {dimensions = array<i32: 0>} : vector<16x128xi32>
      %33 = vector.broadcast %25 : i32 to vector<16x128xi32>
      %34 = arith.cmpi slt, %32, %33 : vector<16x128xi32>
      %cst_12 = arith.constant 0.000000e+00 : f32
      %35 = vector.broadcast %cst_12 : f32 to vector<16x128xf32>
      %36 = arith.select %34, %21, %35 : vector<16x128xi1>, vector<16x128xf32>
      %c0_13 = arith.constant 0 : index
      %c0_14 = arith.constant 0 : index
      %c0_15 = arith.constant 0 : index
      %37 = vector.load %arg4[%c0_13, %c0_14, %c0_15] : memref<1x8x128xf32, #tpu.memory_space<vmem>>, vector<1x8x128xf32>
      %38 = vector.shape_cast %36 : vector<16x128xf32> to vector<2x8x128xf32>
      %cst_16 = arith.constant dense<0.000000e+00> : vector<8x128xf32>
      %39 = vector.multi_reduction <add>, %38, %cst_16 [0] : vector<2x8x128xf32> to vector<8x128xf32>
      %40 = vector.shape_cast %39 : vector<8x128xf32> to vector<1x8x128xf32>
      %41 = arith.addf %37, %40 : vector<1x8x128xf32>
      %c0_17 = arith.constant 0 : index
      %c0_18 = arith.constant 0 : index
      %c0_19 = arith.constant 0 : index
      %42 = vector.load %arg4[%c0_17, %c0_18, %c0_19] : memref<1x8x128xf32, #tpu.memory_space<vmem>>, vector<1x8x128xf32>
      tpu.vector_store %arg4[%c0_17, %c0_18, %c0_19], %41 {strides = array<i32>} : memref<1x8x128xf32, #tpu.memory_space<vmem>>, vector<1x8x128xf32>,
    } else {
    }
    return
  }
  func.func @transform_0(%arg0: i32, %arg1: i32) -> (i32, i32) {
    %c1_i32 = arith.constant 1 : i32
    %0 = arith.muli %arg0, %c1_i32 : i32
    %1 = arith.addi %0, %arg1 : i32
    %c0_i32 = arith.constant 0 : i32
    %2 = arith.minsi %1, %c0_i32 : i32
    %c0_i32_0 = arith.constant 0 : i32
    %c0_i32_1 = arith.constant 0 : i32
    return %2, %c0_i32_0 : i32, i32
  }
  func.func @transform_1(%arg0: i32, %arg1: i32) -> (i32, i32) {
    %c1_i32 = arith.constant 1 : i32
    %0 = arith.muli %arg0, %c1_i32 : i32
    %1 = arith.addi %0, %arg1 : i32
    %c0_i32 = arith.constant 0 : i32
    %2 = arith.minsi %1, %c0_i32 : i32
    %c0_i32_0 = arith.constant 0 : i32
    %c0_i32_1 = arith.constant 0 : i32
    return %2, %c0_i32_0 : i32, i32
  }
  func.func @transform_2(%arg0: i32, %arg1: i32) -> (i32, i32, i32) {
    %c0_i32 = arith.constant 0 : i32
    %c0_i32_0 = arith.constant 0 : i32
    %c0_i32_1 = arith.constant 0 : i32
    return %arg0, %c0_i32, %c0_i32_0 : i32, i32, i32
  }
}

</mosaic_0001>

<bundles_post_ra>
// kernel: tpu_custom_call.1
= control target key start
LH: loop header
LB: loop body
LE: loop exit
PB: predicated region body
PF: predicated region fallthrough
CT: control target
= control target key end

     0   :  { %7 = vsyncpa [#allocation3], 0  ;;  %s308_s0 = inlined_call_operand.hbm [shape: f32[16,128], index: 0, kind: input, shape index: {}]   ;;  %s309_s1 = inlined_call_operand.hbm [shape: f32[16,128], index: 1, kind: input, shape index: {}]   ;;  %s310_s2 = inlined_call_operand.hbm [shape: f32[1,8,128], index: 2, kind: output, shape index: {}]  }
   0x1   :  { %8 = vsyncpa [#allocation6], 0 }
   0x2   :  { %9 = vsyncpa [#allocation4], 0  ;;  %s252_s9 = smov [#allocation2]   ;;  %s180_s13 = scalar_lea.hbm %s308_s0, 256 }
   0x3   :  { %s21_s10 = sshll.u32 %s252_s9, 4  ;;  %p181_p0 = scmp.ne.s32.totalorder %s308_s0, %s180_s13  ;;  %s22_s10 = int_to_ptr.vmem [resolvable:$true] %s21_s10 }
   0x4   :  { %p184_p1 = scmp.lt.u32.totalorder %s180_s13, %s308_s0 }
   0x6   :  { %p186_p2 = pnand %p184_p1, %p181_p0 }
   0x8   :  { %189 = shalt.err (!%p186_p2)
}
   0x9   :  { %s190_s18 = scalar_lea.vmem %s22_s10, 256  ;;  %p195_p4 = scmp.lt.s32.totalorder %s22_s10, %s22_s10 }
   0xa   :  { %p191_p3 = scmp.ne.s32.totalorder %s22_s10, %s190_s18  ;;  %p196_p5 = scmp.lt.s32.totalorder %s190_s18, %s190_s18 }
   0xc   :  { %p197_p6 = por %p196_p5, %p195_p4 }
   0xe   :  { %p198_p7 = pnand %p197_p6, %p191_p3 }
  0x10   :  { %201 = shalt.err (!%p198_p7)
}
  0x11   :  { %s253_s19 = smov 128   ;;  %s254_s20 = smov 8  }
  0x12   :  { %27 = dma.hbm_to_vmem [thread:$0]  %s308_s0, 256, %s22_s10, [#allocation3], %s253_s19, %s253_s19, %s254_s20  }
  0x13   :  { %s255_s23 = smov [#allocation5]   ;;  %s202_s27 = scalar_lea.hbm %s309_s1, 256 }
  0x14   :  { %s39_s24 = sshll.u32 %s255_s23, 4  ;;  %p203_p8 = scmp.ne.s32.totalorder %s309_s1, %s202_s27  ;;  %s40_s24 = int_to_ptr.vmem [resolvable:$true] %s39_s24 }
  0x15   :  { %p206_p9 = scmp.lt.u32.totalorder %s202_s27, %s309_s1 }
  0x17   :  { %p208_p10 = pnand %p206_p9, %p203_p8 }
  0x19   :  { %211 = shalt.err (!%p208_p10)
}
  0x1a   :  { %s212_s4 = scalar_lea.vmem %s40_s24, 256  ;;  %p217_p12 = scmp.lt.s32.totalorder %s40_s24, %s40_s24 }
  0x1b   :  { %p213_p11 = scmp.ne.s32.totalorder %s40_s24, %s212_s4  ;;  %p218_p13 = scmp.lt.s32.totalorder %s212_s4, %s212_s4 }
  0x1d   :  { %p219_p0 = por %p218_p13, %p217_p12 }
  0x1f   :  { %p220_p1 = pnand %p219_p0, %p213_p11 }
  0x21   :  { %223 = shalt.err (!%p220_p1)
}
  0x22   :  { %45 = dma.hbm_to_vmem [thread:$0]  %s309_s1, 256, %s40_s24, [#allocation6], %s253_s19, %s253_s19, %s254_s20  }
  0x23   :  { %246 = dma.done.wait [#allocation3], 256  }
  0x24   :  { %247 = vsyncadd [#allocation3], 4294967040 }
  0x25   :  { %248 = dma.done.wait [#allocation6], 256  }
  0x26   :  { %249 = vsyncadd [#allocation6], 4294967040  ;;  %v65_v0 = vld [vmem:[#allocation2] sm:$0xff]  ;;  %v66_v1 = vld [vmem:[#allocation2 + $0x8] sm:$0xff]  ;;  %s256_s1 = smov [#allocation7]  }
  0x27   :  { %v75_v2 = vand.u32 2147483647, %v65_v0  ;;  %v76_v3 = vand.u32 2147483647, %v66_v1  ;;  %v67_v14 = vld [vmem:[#allocation5] sm:$0xff]  ;;  %v68_v15 = vld [vmem:[#allocation5 + $0x8] sm:$0xff] }
  0x28   :  { %v69_v17 = vmax.f32 %v65_v0, 0.0  ;;  %v71_v18 = vmul.f32 %v67_v14, %v65_v0  ;;  %v70_v21 = vmax.f32 %v66_v1, 0.0  ;;  %v72_v22 = vmul.f32 %v68_v15, %v66_v1  ;;  %s148_s6 = sshll.u32 %s256_s1, 4  ;;  %s149_s6 = int_to_ptr.vmem [resolvable:$true] %s148_s6 }
  0x29   :  { %v77_v4 = vsub.f32 0.0, %v75_v2  ;;  %v78_v5 = vsub.f32 0.0, %v76_v3  ;;  %s224_s7 = scalar_lea.vmem %s149_s6, 128  ;;  %p229_p3 = scmp.lt.s32.totalorder %s149_s6, %s149_s6 }
  0x2a   :  { %v73_v26 = vsub.f32 %v69_v17, %v71_v18  ;;  %v74_v29 = vsub.f32 %v70_v21, %v72_v22  ;;  %p225_p2 = scmp.ne.s32.totalorder %s149_s6, %s224_s7  ;;  %p230_p4 = scmp.lt.s32.totalorder %s224_s7, %s224_s7 }
  0x2b   :  { %v79_v6 = vmul.f32 1.442695, %v77_v4  ;;  %v81_v7 = vmul.f32 1.442695, %v78_v5 }
  0x2c   :  { %p231_p5 = por %p230_p4, %p229_p3 }
  0x2d   :  { %168 = vpow2.f32 %v79_v6 }
  0x2e   :  { %170 = vpow2.f32 %v81_v7  ;;  %p232_p6 = pnand %p231_p5, %p225_p2 }
  0x37   :  { %v169_v8 = vpop.eup %168 }
  0x38   :  { %v171_v9 = vpop.eup %170  ;;  %v83_v10 = vadd.f32 1.0, %v169_v8  ;;  %v86_v12 = vmul.f32 -0.5, %v169_v8  ;;  %v89_v19 = vand.u32 2147483647, %v169_v8 }
  0x39   :  { %v92_v11 = vadd.f32 1.0, %v171_v9  ;;  %v95_v13 = vmul.f32 -0.5, %v171_v9  ;;  %v98_v23 = vand.u32 2147483647, %v171_v9 }
  0x3a   :  { %172 = vlog2.f32 %v83_v10  ;;  %v87_v16 = vadd.f32 1.0, %v86_v12  ;;  %vm90_vm0 = vcmp.lt.f32.partialorder %v89_v19, 0.0004427343 }
  0x3b   :  { %174 = vlog2.f32 %v92_v11  ;;  %v96_v20 = vadd.f32 1.0, %v95_v13  ;;  %vm99_vm1 = vcmp.lt.f32.partialorder %v98_v23, 0.0004427343 }
  0x3c   :  { %v88_v24 = vmul.f32 %v169_v8, %v87_v16 }
  0x3d   :  { %v97_v27 = vmul.f32 %v171_v9, %v96_v20 }
  0x44   :  { %v173_v25 = vpop.eup %172 }
  0x45   :  { %v175_v28 = vpop.eup %174  ;;  %v85_v30 = vmul.f32 0.6931472, %v173_v25 }
  0x46   :  { %v94_v31 = vmul.f32 0.6931472, %v175_v28 }
  0x47   :  { %v91_v32 = vsel %vm90_vm0, %v88_v24, %v85_v30 }
  0x48   :  { %v100_v33 = vsel %vm99_vm1, %v97_v27, %v94_v31  ;;  %v101_v34 = vadd.f32 %v91_v32, %v73_v26 }
  0x49   :  { %v102_v35 = vadd.f32 %v100_v33, %v74_v29 }
  0x4a   :  { %v103_v36 = vsub.f32 0.0, %v101_v34 }
  0x4b   :  { %v104_v37 = vsub.f32 0.0, %v102_v35 }
  0x4c   :  { %v105_v38 = vmul.f32 1.442695, %v103_v36 }
  0x4d   :  { %v107_v39 = vmul.f32 1.442695, %v104_v37 }
  0x4e   :  { %176 = vpow2.f32 %v105_v38 }
  0x4f   :  { %178 = vpow2.f32 %v107_v39 }
  0x58   :  { %v177_v40 = vpop.eup %176 }
  0x59   :  { %v179_v41 = vpop.eup %178  ;;  %v109_v42 = vsub.f32 1.0, %v177_v40 }
  0x5a   :  { %v110_v43 = vsub.f32 1.0, %v179_v41 }
  0x5b   :  { %v111_v44 = vmul.f32 %v109_v42, %v101_v34 }
  0x5c   :  { %v112_v45 = vmul.f32 %v110_v43, %v102_v35 }
  0x5d   :  { %v113_v46 = vmul.f32 %v111_v44, %v109_v42 }
  0x5e   :  { %v114_v47 = vmul.f32 %v112_v45, %v110_v43 }
  0x60   :  { %v123_v48 = vadd.f32 %v114_v47, %v113_v46 }
  0x62   :  { %125 = vst [vmem:[#allocation7] sm:$0xff] %v123_v48 }
  0x63   :  { %235 = shalt.err (!%p232_p6)
}
  0x64   :  { %s236_s10 = scalar_lea.hbm %s310_s2, 128 }
  0x65   :  { %p237_p7 = scmp.ne.s32.totalorder %s310_s2, %s236_s10  ;;  %p240_p8 = scmp.lt.u32.totalorder %s236_s10, %s310_s2 }
  0x67   :  { %p242_p9 = pnand %p240_p8, %p237_p7 }
  0x69   :  { %245 = shalt.err (!%p242_p9)
}
  0x6a   :  { %151 = dma.vmem_to_hbm [thread:$0]  %s149_s6, 128, %s310_s2, [#allocation4]  }
  0x6b   :  { %250 = dma.done.wait [#allocation4], 128  }
  0x6c   :  { %251 = vsyncadd [#allocation4], 4294967168 }
  0x6d   :  { %155 = vsyncpa [#allocation3], 1 }
  0x6e   :  { %156 = vsyncpa [#allocation6], 1 }
  0x6f   :  { %157 = vsyncpa [#allocation4], 1 }

</bundles_post_ra>
